<compile_context>
chip_gen: v7x
topology: tpu7x:2x2x1
jax: 0.10.0
libtpu: 0.0.40
codegen_flags: <defaults>
</compile_context>

<pallas_src>
import functools

import jax
import jax.numpy as jnp
from jax.experimental import pallas as pl
from jax.experimental.pallas import tpu as pltpu


def _round_up(n: int, m: int) -> int:
    return ((n + m - 1) // m) * m


def _head_kernel(*refs, use_m1: bool, use_m2: bool):
    """Fused dropout -> fc1 -> ReLU -> dropout -> fc2 on one batch tile.

    Ref order: x, [m1], w1, b1, [m2], w2, b2, out   (masks present only if used).
    """
    it = iter(refs)
    x_ref = next(it)
    m1_ref = next(it) if use_m1 else None
    w1_ref = next(it)
    b1_ref = next(it)
    m2_ref = next(it) if use_m2 else None
    w2_ref = next(it)
    b2_ref = next(it)
    o_ref = next(it)

    x = x_ref[...]
    if use_m1:
        x = x * m1_ref[...]                      # inverted-dropout mask (pre-scaled)

    # fc1 + ReLU (MXU matmul, f32 accumulate)
    h = jnp.dot(x, w1_ref[...], preferred_element_type=jnp.float32) + b1_ref[...]
    h = jnp.maximum(h, 0.0)

    if use_m2:
        h = h * m2_ref[...]

    # fc2
    y = jnp.dot(h, w2_ref[...], preferred_element_type=jnp.float32) + b2_ref[...]
    o_ref[...] = y.astype(o_ref.dtype)


def _pick_tile_b(B, din_p, dmid_p, dout_p, use_m1, use_m2):
    """Largest multiple-of-8 batch tile fitting a conservative VMEM budget."""
    budget = 24 * 1024 * 1024          # headroom under 32 MiB scoped default (v7x-safe)
    bpe = 4                            # f32 bytes
    # Resident (double-buffered) weights / biases.
    resident = 2 * bpe * (din_p * dmid_p + dmid_p * dout_p + dmid_p + dout_p)
    # Per-row streamed bytes: x (+mask1), mask2, out — double-buffered — plus the
    # f32 intermediate h.
    per_row = bpe * (2 * (din_p * (2 if use_m1 else 1)
                          + (dmid_p if use_m2 else 0)
                          + dout_p)
                     + 2 * dmid_p)
    avail = max(budget - resident, per_row * 8)
    tile = max(8, min(1024, (avail // per_row) // 8 * 8))
    tile = min(tile, _round_up(B, 8))
    return int(tile)


def head_forward(x, w1, b1, w2, b2, *, p1, p2, dropout_on=True, rng_key=None,
                 tile_b=None):
    """x: (B, input_dim) f32; w1: (in, mid); b1: (1, mid); w2: (mid, out); b2: (1, out).

    Returns (B, out_dim) f32, matching Head.forward semantics.
    """
    f32 = jnp.float32
    B, din = x.shape
    dmid = w1.shape[1]
    dout = w2.shape[1]

    p1 = float(p1)
    p2 = float(p2)
    use_m1 = bool(dropout_on) and p1 > 0.0
    use_m2 = bool(dropout_on) and p2 > 0.0
    if (use_m1 or use_m2) and rng_key is None:
        raise ValueError("rng_key is required when dropout is active")

    # Lane-dense padding of all feature dims (multiples of 128).
    din_p = _round_up(din, 128)
    dmid_p = _round_up(dmid, 128)
    dout_p = _round_up(max(dout, 1), 128)

    if tile_b is None:
        tile_b = _pick_tile_b(B, din_p, dmid_p, dout_p, use_m1, use_m2)
    B_p = _round_up(B, tile_b)
    grid = (pl.cdiv(B_p, tile_b),)

    # Zero-padded operands (padding contributes exactly zero to the real outputs).
    xp = jnp.zeros((B_p, din_p), f32).at[:B, :din].set(x.astype(f32))
    w1p = jnp.zeros((din_p, dmid_p), f32).at[:din, :dmid].set(w1.astype(f32))
    b1p = jnp.zeros((1, dmid_p), f32).at[:, :dmid].set(jnp.reshape(b1, (1, dmid)).astype(f32))
    w2p = jnp.zeros((dmid_p, dout_p), f32).at[:dmid, :dout].set(w2.astype(f32))
    b2p = jnp.zeros((1, dout_p), f32).at[:, :dout].set(jnp.reshape(b2, (1, dout)).astype(f32))

    # Dropout keep-masks, pre-scaled by 1/(1-p) (inverted dropout).
    m1 = m2 = None
    if use_m1 or use_m2:
        k1, k2 = jax.random.split(rng_key)
        if use_m1:
            keep1 = jax.random.bernoulli(k1, 1.0 - p1, (B_p, din_p))
            m1 = keep1.astype(f32) * (1.0 / (1.0 - p1))
        if use_m2:
            keep2 = jax.random.bernoulli(k2, 1.0 - p2, (B_p, dmid_p))
            m2 = keep2.astype(f32) * (1.0 / (1.0 - p2))

    # BlockSpecs: batch-tiled activations/masks/output; resident weights/biases.
    row_din = pl.BlockSpec((tile_b, din_p), lambda i: (i, 0))
    row_dmid = pl.BlockSpec((tile_b, dmid_p), lambda i: (i, 0))
    row_dout = pl.BlockSpec((tile_b, dout_p), lambda i: (i, 0))
    const = lambda i: (0, 0)

    args = [xp]
    specs = [row_din]
    if use_m1:
        args.append(m1)
        specs.append(row_din)
    args += [w1p, b1p]
    specs += [pl.BlockSpec((din_p, dmid_p), const), pl.BlockSpec((1, dmid_p), const)]
    if use_m2:
        args.append(m2)
        specs.append(row_dmid)
    args += [w2p, b2p]
    specs += [pl.BlockSpec((dmid_p, dout_p), const), pl.BlockSpec((1, dout_p), const)]

    kernel = functools.partial(_head_kernel, use_m1=use_m1, use_m2=use_m2)

    # Only attach TPU compiler params when actually compiling for TPU (keeps the
    # CPU/interpret fallback path clean).
    compiler_params = None
    if jax.default_backend() == "tpu":
        compiler_params = pltpu.CompilerParams(dimension_semantics=("parallel",))

    out_p = pl.pallas_call(
        kernel,
        out_shape=jax.ShapeDtypeStruct((B_p, dout_p), f32),
        grid=grid,
        in_specs=specs,
        out_specs=row_dout,
        compiler_params=compiler_params,
    )(*args)

    return out_p[:B, :dout]


def init_head_params(key, input_dim, intermediate_dim, heteroscedastic):
    """Deterministic init mimicking nn.Linear's U(-1/sqrt(fan_in), 1/sqrt(fan_in))."""
    out_dim = 2 if heteroscedastic else 1
    k1, k2, k3, k4 = jax.random.split(key, 4)
    lim1 = 1.0 / (input_dim ** 0.5)
    lim2 = 1.0 / (intermediate_dim ** 0.5)
    # weights stored (in, out) -- transposed vs PyTorch's (out, in)
    w1 = jax.random.uniform(k1, (input_dim, intermediate_dim), jnp.float32, -lim1, lim1)
    b1 = jax.random.uniform(k2, (1, intermediate_dim), jnp.float32, -lim1, lim1)
    w2 = jax.random.uniform(k3, (intermediate_dim, out_dim), jnp.float32, -lim2, lim2)
    b2 = jax.random.uniform(k4, (1, out_dim), jnp.float32, -lim2, lim2)
    return w1, b1, w2, b2


if __name__ == "__main__":
    # Small shapes consistent with the module's forward: x is (batch, input_dim)
    batch = 8
    input_dim = 32
    intermediate_dim = 64
    heteroscedastic = True
    dropout_config = {"p_second_to_last_layer": 0.1, "p_last_layer": 0.2}

    key = jax.random.PRNGKey(0)
    kx, kp, kd = jax.random.split(key, 3)
    x = jax.random.normal(kx, (batch, input_dim), jnp.float32)
    w1, b1, w2, b2 = init_head_params(kp, input_dim, intermediate_dim, heteroscedastic)

    # Training-mode forward (dropout active).
    out = head_forward(
        x, w1, b1, w2, b2,
        p1=dropout_config["p_second_to_last_layer"],
        p2=dropout_config["p_last_layer"],
        dropout_on=True, rng_key=kd,
    )
    out = jax.block_until_ready(out)
    assert out.shape == (batch, 2 if heteroscedastic else 1)
    assert bool(jnp.all(jnp.isfinite(out)))

    # Eval-mode forward (dropout off) checked exactly against a pure-JAX reference.
    out_eval = jax.block_until_ready(
        head_forward(x, w1, b1, w2, b2, p1=0.0, p2=0.0, dropout_on=False))
    ref = jnp.maximum(x @ w1 + b1, 0.0) @ w2 + b2
    assert jnp.allclose(out_eval, ref, atol=1e-5, rtol=1e-5)

    print("KERNEL_OK")
</pallas_src>

<mosaic_0001>
module attributes {stable_mosaic.version = 11 : i64} {
  func.func @_head_kernel(%arg0: i32, %arg1: memref<8x128xf32, #tpu.memory_space<vmem>>, %arg2: memref<8x128xf32, #tpu.memory_space<vmem>>, %arg3: memref<128x128xf32, #tpu.memory_space<vmem>>, %arg4: memref<1x128xf32, #tpu.memory_space<vmem>>, %arg5: memref<8x128xf32, #tpu.memory_space<vmem>>, %arg6: memref<128x128xf32, #tpu.memory_space<vmem>>, %arg7: memref<1x128xf32, #tpu.memory_space<vmem>>, %arg8: memref<8x128xf32, #tpu.memory_space<vmem>>) attributes {dimension_semantics = [#tpu.dimension_semantics<arbitrary>], iteration_bounds = array<i64: 1>, scalar_prefetch = 0 : i64, scratch_operands = 0 : i64, tpu.core_type = #tpu.core_type<tc>, window_params = [{transform_indices = @transform_0, window_bounds = array<i64: 8, 128>}, {transform_indices = @transform_1, window_bounds = array<i64: 8, 128>}, {pipeline_mode = #tpu.pipeline_mode<synchronous>, transform_indices = @transform_2, window_bounds = array<i64: 128, 128>}, {pipeline_mode = #tpu.pipeline_mode<synchronous>, transform_indices = @transform_3, window_bounds = array<i64: 1, 128>}, {transform_indices = @transform_4, window_bounds = array<i64: 8, 128>}, {pipeline_mode = #tpu.pipeline_mode<synchronous>, transform_indices = @transform_5, window_bounds = array<i64: 128, 128>}, {pipeline_mode = #tpu.pipeline_mode<synchronous>, transform_indices = @transform_6, window_bounds = array<i64: 1, 128>}, {transform_indices = @transform_7, window_bounds = array<i64: 8, 128>}]} {
    %c0 = arith.constant 0 : index
    %c0_0 = arith.constant 0 : index
    %0 = vector.load %arg1[%c0, %c0_0] : memref<8x128xf32, #tpu.memory_space<vmem>>, vector<8x128xf32>
    %c0_1 = arith.constant 0 : index
    %c0_2 = arith.constant 0 : index
    %1 = vector.load %arg2[%c0_1, %c0_2] : memref<8x128xf32, #tpu.memory_space<vmem>>, vector<8x128xf32>
    %2 = arith.mulf %0, %1 : vector<8x128xf32>
    %c0_3 = arith.constant 0 : index
    %c0_4 = arith.constant 0 : index
    %3 = vector.load %arg3[%c0_3, %c0_4] : memref<128x128xf32, #tpu.memory_space<vmem>>, vector<128x128xf32>
    %cst = arith.constant dense<0.000000e+00> : vector<8x128xf32>
    %4 = tpu.matmul %2, %3, %cst {dimension_numbers = #tpu.dot_dimension_numbers<[1], [0], [0], [1], [0, 0, 1, 1], [], []>} : vector<8x128xf32>, vector<128x128xf32>, vector<8x128xf32> -> vector<8x128xf32>
    %c0_5 = arith.constant 0 : index
    %c0_6 = arith.constant 0 : index
    %5 = vector.load %arg4[%c0_5, %c0_6] : memref<1x128xf32, #tpu.memory_space<vmem>>, vector<1x128xf32>
    %6 = vector.broadcast %5 : vector<1x128xf32> to vector<8x128xf32>
    %7 = arith.addf %4, %6 : vector<8x128xf32>
    %cst_7 = arith.constant 0.000000e+00 : f32
    %8 = vector.broadcast %cst_7 : f32 to vector<8x128xf32>
    %9 = arith.maximumf %7, %8 : vector<8x128xf32>
    %c0_8 = arith.constant 0 : index
    %c0_9 = arith.constant 0 : index
    %10 = vector.load %arg5[%c0_8, %c0_9] : memref<8x128xf32, #tpu.memory_space<vmem>>, vector<8x128xf32>
    %11 = arith.mulf %9, %10 : vector<8x128xf32>
    %c0_10 = arith.constant 0 : index
    %c0_11 = arith.constant 0 : index
    %12 = vector.load %arg6[%c0_10, %c0_11] : memref<128x128xf32, #tpu.memory_space<vmem>>, vector<128x128xf32>
    %cst_12 = arith.constant dense<0.000000e+00> : vector<8x128xf32>
    %13 = tpu.matmul %11, %12, %cst_12 {dimension_numbers = #tpu.dot_dimension_numbers<[1], [0], [0], [1], [0, 0, 1, 1], [], []>} : vector<8x128xf32>, vector<128x128xf32>, vector<8x128xf32> -> vector<8x128xf32>
    %c0_13 = arith.constant 0 : index
    %c0_14 = arith.constant 0 : index
    %14 = vector.load %arg7[%c0_13, %c0_14] : memref<1x128xf32, #tpu.memory_space<vmem>>, vector<1x128xf32>
    %15 = vector.broadcast %14 : vector<1x128xf32> to vector<8x128xf32>
    %16 = arith.addf %13, %15 : vector<8x128xf32>
    %c0_15 = arith.constant 0 : index
    %c0_16 = arith.constant 0 : index
    %17 = vector.load %arg8[%c0_15, %c0_16] : memref<8x128xf32, #tpu.memory_space<vmem>>, vector<8x128xf32>
    tpu.vector_store %arg8[%c0_15, %c0_16], %16 {strides = array<i32>} : memref<8x128xf32, #tpu.memory_space<vmem>>, vector<8x128xf32>,
    return
  }
  func.func @transform_0(%arg0: i32) -> (i32, i32) {
    %c0_i32 = arith.constant 0 : i32
    %c0_i32_0 = arith.constant 0 : i32
    return %arg0, %c0_i32 : i32, i32
  }
  func.func @transform_1(%arg0: i32) -> (i32, i32) {
    %c0_i32 = arith.constant 0 : i32
    %c0_i32_0 = arith.constant 0 : i32
    return %arg0, %c0_i32 : i32, i32
  }
  func.func @transform_2(%arg0: i32) -> (i32, i32) {
    %c0_i32 = arith.constant 0 : i32
    %c0_i32_0 = arith.constant 0 : i32
    %c0_i32_1 = arith.constant 0 : i32
    return %c0_i32, %c0_i32_0 : i32, i32
  }
  func.func @transform_3(%arg0: i32) -> (i32, i32) {
    %c0_i32 = arith.constant 0 : i32
    %c0_i32_0 = arith.constant 0 : i32
    %c0_i32_1 = arith.constant 0 : i32
    return %c0_i32, %c0_i32_0 : i32, i32
  }
  func.func @transform_4(%arg0: i32) -> (i32, i32) {
    %c0_i32 = arith.constant 0 : i32
    %c0_i32_0 = arith.constant 0 : i32
    return %arg0, %c0_i32 : i32, i32
  }
  func.func @transform_5(%arg0: i32) -> (i32, i32) {
    %c0_i32 = arith.constant 0 : i32
    %c0_i32_0 = arith.constant 0 : i32
    %c0_i32_1 = arith.constant 0 : i32
    return %c0_i32, %c0_i32_0 : i32, i32
  }
  func.func @transform_6(%arg0: i32) -> (i32, i32) {
    %c0_i32 = arith.constant 0 : i32
    %c0_i32_0 = arith.constant 0 : i32
    %c0_i32_1 = arith.constant 0 : i32
    return %c0_i32, %c0_i32_0 : i32, i32
  }
  func.func @transform_7(%arg0: i32) -> (i32, i32) {
    %c0_i32 = arith.constant 0 : i32
    %c0_i32_0 = arith.constant 0 : i32
    return %arg0, %c0_i32 : i32, i32
  }
}

</mosaic_0001>

<bundles_post_ra>
// kernel: tpu_custom_call.1
= control target key start
LH: loop header
LB: loop body
LE: loop exit
PB: predicated region body
PF: predicated region fallthrough
CT: control target
= control target key end

     0   :  { %12 = vsyncpa [#allocation3], 0  ;;  %s705_s0 = inlined_call_operand.hbm [shape: f32[8,128], index: 0, kind: input, shape index: {}]   ;;  %s706_s1 = inlined_call_operand.hbm [shape: f32[8,128], index: 1, kind: input, shape index: {}]   ;;  %s707_s2 = inlined_call_operand.hbm [shape: f32[128,128], index: 2, kind: input, shape index: {}]   ;;  %s708_s3 = inlined_call_operand.vmem [shape: f32[1,128], index: 3, kind: input, shape index: {}]   ;;  %s709_s4 = inlined_call_operand.vmem [shape: f32[8,128], index: 4, kind: input, shape index: {}]   ;;  %s710_s5 = inlined_call_operand.hbm [shape: f32[128,128], index: 5, kind: input, shape index: {}]   ;;  %s711_s6 = inlined_call_operand.vmem [shape: f32[1,128], index: 6, kind: input, shape index: {}]   ;;  %s712_s7 = inlined_call_operand.hbm [shape: f32[8,128], index: 7, kind: output, shape index: {}]  }
   0x1   :  { %13 = vsyncpa [#allocation6], 0 }
   0x2   :  { %14 = vsyncpa [#allocation9], 0 }
   0x3   :  { %15 = vsyncpa [#allocation4], 0  ;;  %s570_s24 = smov [#allocation5]   ;;  %s571_s26 = smov [#allocation2]  }
   0x4   :  { %s32_s25 = sshll.u32 %s570_s24, 4  ;;  %s22_s27 = sshll.u32 %s571_s26, 4  ;;  %s33_s25 = int_to_ptr.vmem [resolvable:$true] %s32_s25  ;;  %s23_s27 = int_to_ptr.vmem [resolvable:$true] %s22_s27 }
   0x5   :  { %s452_s30 = scalar_lea.hbm %s706_s1, 128 }
   0x6   :  { %p453_p0 = scmp.ne.s32.totalorder %s706_s1, %s452_s30  ;;  %p456_p1 = scmp.lt.u32.totalorder %s452_s30, %s706_s1 }
   0x8   :  { %p458_p2 = pnand %p456_p1, %p453_p0 }
   0xa   :  { %461 = shalt.err (!%p458_p2)
}
   0xb   :  { %s462_s12 = scalar_lea.vmem %s33_s25, 128  ;;  %p467_p4 = scmp.lt.s32.totalorder %s33_s25, %s33_s25 }
   0xc   :  { %p463_p3 = scmp.ne.s32.totalorder %s33_s25, %s462_s12  ;;  %p468_p5 = scmp.lt.s32.totalorder %s462_s12, %s462_s12 }
   0xe   :  { %p469_p6 = por %p468_p5, %p467_p4 }
  0x10   :  { %p470_p7 = pnand %p469_p6, %p463_p3 }
  0x12   :  { %473 = shalt.err (!%p470_p7)
}
  0x13   :  { %35 = dma.hbm_to_vmem [thread:$0]  %s706_s1, 128, %s33_s25, [#allocation6]  }
  0x14   :  { %s474_s17 = scalar_lea.hbm %s705_s0, 128 }
  0x15   :  { %p475_p8 = scmp.ne.s32.totalorder %s705_s0, %s474_s17  ;;  %p478_p9 = scmp.lt.u32.totalorder %s474_s17, %s705_s0 }
  0x17   :  { %p480_p10 = pnand %p478_p9, %p475_p8 }
  0x19   :  { %483 = shalt.err (!%p480_p10)
}
  0x1a   :  { %s484_s22 = scalar_lea.vmem %s23_s27, 128  ;;  %p489_p12 = scmp.lt.s32.totalorder %s23_s27, %s23_s27 }
  0x1b   :  { %p485_p11 = scmp.ne.s32.totalorder %s23_s27, %s484_s22  ;;  %p490_p13 = scmp.lt.s32.totalorder %s484_s22, %s484_s22 }
  0x1d   :  { %p491_p0 = por %p490_p13, %p489_p12 }
  0x1f   :  { %p492_p1 = pnand %p491_p0, %p485_p11 }
  0x21   :  { %495 = shalt.err (!%p492_p1)
}
  0x22   :  { %25 = dma.hbm_to_vmem [thread:$0]  %s705_s0, 128, %s23_s27, [#allocation3]  }
  0x23   :  { %s572_s24 = smov [#allocation7]   ;;  %s496_s29 = scalar_lea.hbm %s707_s2, 2048 }
  0x24   :  { %s41_s25 = sshll.u32 %s572_s24, 4  ;;  %p497_p2 = scmp.ne.s32.totalorder %s707_s2, %s496_s29  ;;  %s42_s25 = int_to_ptr.vmem [resolvable:$true] %s41_s25 }
  0x25   :  { %p500_p3 = scmp.lt.u32.totalorder %s496_s29, %s707_s2 }
  0x27   :  { %p502_p4 = pnand %p500_p3, %p497_p2 }
  0x29   :  { %505 = shalt.err (!%p502_p4)
}
  0x2a   :  { %s506_s11 = scalar_lea.vmem %s42_s25, 2048  ;;  %p511_p6 = scmp.lt.s32.totalorder %s42_s25, %s42_s25 }
  0x2b   :  { %p507_p5 = scmp.ne.s32.totalorder %s42_s25, %s506_s11  ;;  %p512_p7 = scmp.lt.s32.totalorder %s506_s11, %s506_s11 }
  0x2d   :  { %p513_p8 = por %p512_p7, %p511_p6 }
  0x2f   :  { %p514_p9 = pnand %p513_p8, %p507_p5 }
  0x31   :  { %517 = shalt.err (!%p514_p9)
}
  0x32   :  { %s573_s0 = smov 128   ;;  %s574_s27 = smov 8  }
  0x33   :  { %47 = dma.hbm_to_vmem [thread:$0]  %s707_s2, 2048, %s42_s25, [#allocation6], %s573_s0, %s573_s0, %s574_s27  }
  0x34   :  { %s575_s14 = smov [#allocation8]   ;;  %s518_s18 = scalar_lea.hbm %s710_s5, 2048 }
  0x35   :  { %s57_s15 = sshll.u32 %s575_s14, 4  ;;  %p519_p10 = scmp.ne.s32.totalorder %s710_s5, %s518_s18  ;;  %s58_s15 = int_to_ptr.vmem [resolvable:$true] %s57_s15 }
  0x36   :  { %p522_p11 = scmp.lt.u32.totalorder %s518_s18, %s710_s5 }
  0x38   :  { %p524_p12 = pnand %p522_p11, %p519_p10 }
  0x3a   :  { %527 = shalt.err (!%p524_p12)
}
  0x3b   :  { %s528_s1 = scalar_lea.vmem %s58_s15, 2048  ;;  %p533_p0 = scmp.lt.s32.totalorder %s58_s15, %s58_s15 }
  0x3c   :  { %p529_p13 = scmp.ne.s32.totalorder %s58_s15, %s528_s1  ;;  %p534_p1 = scmp.lt.s32.totalorder %s528_s1, %s528_s1 }
  0x3e   :  { %p535_p2 = por %p534_p1, %p533_p0 }
  0x40   :  { %p536_p3 = pnand %p535_p2, %p529_p13 }
  0x42   :  { %539 = shalt.err (!%p536_p3)
}
  0x43   :  { %63 = dma.hbm_to_vmem [thread:$0]  %s710_s5, 2048, %s58_s15, [#allocation9], %s573_s0, %s573_s0, %s574_s27  }
  0x44   :  { %562 = dma.done.wait [#allocation3], 128  }
  0x45   :  { %563 = vsyncadd [#allocation3], 4294967168 }
  0x46   :  { %564 = dma.done.wait [#allocation6], 2176  }
  0x47   :  { %565 = vsyncadd [#allocation6], 4294965120 }
  0x48   :  { %566 = dma.done.wait [#allocation9], 2048  }
  0x49   :  { %567 = vsyncadd [#allocation9], 4294965248  ;;  %v576_v0 = vmov 0.0|0.0   ;;  %vm577_vm0 = vmmov 0   ;;  %v578_v1 = vmov 0.0   ;;  %v81_v2 = vld [vmem:[#allocation7] sm:$0xff] }
  0x4a   :  { %394 = vmatprep.subr.bf16.mxu0 %v576_v0  ;;  %356 = vmatprep.mubr.msk.f32.mxu0 %vm577_vm0, %v578_v1  ;;  %v82_v3 = vld [vmem:[#allocation7 + $0x8] sm:$0xff]  ;;  %v83_v4 = vld [vmem:[#allocation7 + $0x10] sm:$0xff]  ;;  %v84_v6 = vld [vmem:[#allocation7 + $0x18] sm:$0xff]  ;;  %s579_s30 = smov [#allocation10]  }
  0x4b   :  { %418 = vmatprep.subr.bf16.mxu1 %v576_v0  ;;  %391 = vmatprep.mubr.msk.f32.mxu1 %vm577_vm0, %v578_v1  ;;  %v395_v5 = vpack.c.bf16 %v82_v3, %v81_v2  ;;  %v398_v7 = vpack.c.bf16 %v84_v6, %v83_v4  ;;  %v85_v8 = vld [vmem:[#allocation7 + $0x20] sm:$0xff]  ;;  %v86_v9 = vld [vmem:[#allocation7 + $0x28] sm:$0xff]  ;;  %v179_v12 = vld [vmem:[#allocation8 + $0x10] sm:$0xff]  ;;  %s277_s8 = sshll.u32 %s579_s30, 4  ;;  %s278_s8 = int_to_ptr.vmem [resolvable:$true] %s277_s8 }
  0x4c   :  { %v177_v10 = vld [vmem:[#allocation8] sm:$0xff]  ;;  %v178_v11 = vld [vmem:[#allocation8 + $0x8] sm:$0xff]  ;;  %v401_v13 = vpack.c.bf16 %v86_v9, %v85_v8  ;;  %v180_v15 = vld [vmem:[#allocation8 + $0x18] sm:$0xff]  ;;  %p545_p5 = scmp.lt.s32.totalorder %s278_s8, %s278_s8 }
  0x4d   :  { %396 = vmatpush3.bf16.msra.mxu0 %v395_v5  ;;  %v419_v14 = vpack.c.bf16 %v178_v11, %v177_v10  ;;  %v87_v16 = vld [vmem:[#allocation7 + $0x30] sm:$0xff]  ;;  %v88_v17 = vld [vmem:[#allocation7 + $0x38] sm:$0xff]  ;;  %v422_v18 = vpack.c.bf16 %v180_v15, %v179_v12  ;;  %v181_v19 = vld [vmem:[#allocation8 + $0x20] sm:$0xff] }
  0x4e   :  { %397 = vmatprep.subr.bf16.mxu0 %v576_v0  ;;  %v182_v20 = vld [vmem:[#allocation8 + $0x28] sm:$0xff]  ;;  %v404_v21 = vpack.c.bf16 %v88_v17, %v87_v16  ;;  %v89_v22 = vld [vmem:[#allocation7 + $0x40] sm:$0xff]  ;;  %v183_v25 = vld [vmem:[#allocation8 + $0x30] sm:$0xff] }
  0x4f   :  { %420 = vmatpush3.bf16.msra.mxu1 %v419_v14  ;;  %v90_v23 = vld [vmem:[#allocation7 + $0x48] sm:$0xff]  ;;  %v425_v24 = vpack.c.bf16 %v182_v20, %v181_v19  ;;  %v184_v26 = vld [vmem:[#allocation8 + $0x38] sm:$0xff]  ;;  %v91_v28 = vld [vmem:[#allocation7 + $0x50] sm:$0xff] }
  0x50   :  { %421 = vmatprep.subr.bf16.mxu1 %v576_v0  ;;  %v407_v27 = vpack.c.bf16 %v90_v23, %v89_v22  ;;  %v92_v29 = vld [vmem:[#allocation7 + $0x58] sm:$0xff]  ;;  %v428_v30 = vpack.c.bf16 %v184_v26, %v183_v25  ;;  %v185_v31 = vld [vmem:[#allocation8 + $0x40] sm:$0xff]  ;;  %v186_v32 = vld [vmem:[#allocation8 + $0x48] sm:$0xff] }
  0x51   :  { %399 = vmatpush3.bf16.msra.mxu0 %v398_v7  ;;  %v410_v33 = vpack.c.bf16 %v92_v29, %v91_v28  ;;  %v93_v34 = vld [vmem:[#allocation7 + $0x60] sm:$0xff]  ;;  %v94_v35 = vld [vmem:[#allocation7 + $0x68] sm:$0xff]  ;;  %v431_v36 = vpack.c.bf16 %v186_v32, %v185_v31  ;;  %v187_v37 = vld [vmem:[#allocation8 + $0x50] sm:$0xff] }
  0x52   :  { %400 = vmatprep.subr.bf16.mxu0 %v576_v0  ;;  %v188_v38 = vld [vmem:[#allocation8 + $0x58] sm:$0xff]  ;;  %v413_v39 = vpack.c.bf16 %v94_v35, %v93_v34  ;;  %v95_v40 = vld [vmem:[#allocation7 + $0x70] sm:$0xff]  ;;  %v189_v47 = vld [vmem:[#allocation8 + $0x60] sm:$0xff] }
  0x53   :  { %423 = vmatpush3.bf16.msra.mxu1 %v422_v18  ;;  %v96_v41 = vld [vmem:[#allocation7 + $0x78] sm:$0xff]  ;;  %v434_v42 = vpack.c.bf16 %v188_v38, %v187_v37  ;;  %v78_v44 = vld [vmem:[#allocation2] sm:$0xff]  ;;  %v190_v48 = vld [vmem:[#allocation8 + $0x68] sm:$0xff] }
  0x54   :  { %424 = vmatprep.subr.bf16.mxu1 %v576_v0  ;;  %v416_v43 = vpack.c.bf16 %v96_v41, %v95_v40  ;;  %v79_v45 = vld [vmem:[#allocation5] sm:$0xff]  ;;  %v437_v49 = vpack.c.bf16 %v190_v48, %v189_v47  ;;  %v191_v50 = vld [vmem:[#allocation8 + $0x70] sm:$0xff] }
  0x55   :  { %402 = vmatpush3.bf16.msra.mxu0 %v401_v13  ;;  %v80_v46 = vmul.f32 %v79_v45, %v78_v44  ;;  %v192_v51 = vld [vmem:[#allocation8 + $0x78] sm:$0xff]  ;;  %v288_v53 = vld [vmem:[%s708_s3] ss:$0 sm:$0xff]  ;;  %s540_s3 = scalar_lea.vmem %s278_s8, 128 }
  0x56   :  { %403 = vmatprep.subr.bf16.mxu0 %v576_v0  ;;  %v440_v52 = vpack.c.bf16 %v192_v51, %v191_v50  ;;  %v175_v57 = vld [vmem:[%s709_s4] sm:$0xff]  ;;  %p541_p4 = scmp.ne.s32.totalorder %s278_s8, %s540_s3  ;;  %p546_p6 = scmp.lt.s32.totalorder %s540_s3, %s540_s3 }
  0x57   :  { %426 = vmatpush3.bf16.msra.mxu1 %v425_v24  ;;  %v289_v60 = vld [vmem:[%s711_s6] ss:$0 sm:$0xff] }
  0x58   :  { %427 = vmatprep.subr.bf16.mxu1 %v576_v0  ;;  %p547_p7 = por %p546_p6, %p545_p5 }
  0x59   :  { %405 = vmatpush3.bf16.msra.mxu0 %v404_v21 }
  0x5a   :  { %406 = vmatprep.subr.bf16.mxu0 %v576_v0  ;;  %p548_p8 = pnand %p547_p7, %p541_p4 }
  0x5b   :  { %429 = vmatpush3.bf16.msra.mxu1 %v428_v30 }
  0x5c   :  { %430 = vmatprep.subr.bf16.mxu1 %v576_v0 }
  0x5d   :  { %408 = vmatpush3.bf16.msra.mxu0 %v407_v27 }
  0x5e   :  { %409 = vmatprep.subr.bf16.mxu0 %v576_v0 }
  0x5f   :  { %432 = vmatpush3.bf16.msra.mxu1 %v431_v36 }
  0x60   :  { %433 = vmatprep.subr.bf16.mxu1 %v576_v0 }
  0x61   :  { %411 = vmatpush3.bf16.msra.mxu0 %v410_v33 }
  0x62   :  { %412 = vmatprep.subr.bf16.mxu0 %v576_v0 }
  0x63   :  { %435 = vmatpush3.bf16.msra.mxu1 %v434_v42 }
  0x64   :  { %436 = vmatprep.subr.bf16.mxu1 %v576_v0 }
  0x65   :  { %414 = vmatpush3.bf16.msra.mxu0 %v413_v39 }
  0x66   :  { %415 = vmatprep.subr.bf16.mxu0 %v576_v0 }
  0x67   :  { %438 = vmatpush3.bf16.msra.mxu1 %v437_v49 }
  0x68   :  { %439 = vmatprep.subr.bf16.mxu1 %v576_v0 }
  0x69   :  { %417 = vmatpush3.bf16.msra.mxu0 %v416_v43 }
  0x6b   :  { %441 = vmatpush3.bf16.msra.mxu1 %v440_v52 }
  0x6c   :  { %357 = vmatmul.mubr.f32.vlgmr.msra.gmra.mrb[0].mxu0 %v80_v46 }
 0x13f   :  { %v170_v54 = vpop.f32.mrb[0].mxu0 }
 0x140   :  { %v171_v55 = vadd.f32 %v288_v53, %v170_v54  ;;  %v358_v56 = vpop.f32.mrb[1].mxu0 }
 0x142   :  { %v174_v58 = vmax.f32 %v171_v55, 0.0 }
 0x144   :  { %v176_v59 = vmul.f32 %v175_v57, %v174_v58 }
 0x146   :  { %392 = vmatmul.mubr.f32.vlgmr.msra.gmra.mrb[0].mxu1 %v176_v59 }
 0x219   :  { %v266_v61 = vpop.f32.mrb[0].mxu1 }
 0x21a   :  { %v267_v62 = vadd.f32 %v289_v60, %v266_v61  ;;  %v393_v63 = vpop.f32.mrb[1].mxu1 }
 0x21c   :  { %270 = vst [vmem:[#allocation10] sm:$0xff] %v267_v62 }
 0x21d   :  { %551 = shalt.err (!%p548_p8)
}
 0x21e   :  { %s552_s10 = scalar_lea.hbm %s712_s7, 128 }
 0x21f   :  { %p553_p9 = scmp.ne.s32.totalorder %s712_s7, %s552_s10  ;;  %p556_p10 = scmp.lt.u32.totalorder %s552_s10, %s712_s7 }
 0x221   :  { %p558_p11 = pnand %p556_p10, %p553_p9 }
 0x223   :  { %561 = shalt.err (!%p558_p11)
}
 0x224   :  { %280 = dma.vmem_to_hbm [thread:$0]  %s278_s8, 128, %s712_s7, [#allocation4]  }
 0x225   :  { %568 = dma.done.wait [#allocation4], 128  }
 0x226   :  { %569 = vsyncadd [#allocation4], 4294967168 }
 0x227   :  { %284 = vsyncpa [#allocation3], 1 }
 0x228   :  { %285 = vsyncpa [#allocation6], 1 }
 0x229   :  { %286 = vsyncpa [#allocation9], 1 }
 0x22a   :  { %287 = vsyncpa [#allocation4], 1 }

</bundles_post_ra>
